<compile_context>
chip_gen: v5e
topology: v5e:2x2
jax: 0.10.0
libtpu: 0.0.40
codegen_flags: <defaults>
</compile_context>

<pallas_src>
import numpy as np
import jax
import jax.numpy as jnp
from jax.experimental import pallas as pl
from jax.experimental.pallas import tpu as pltpu


# ---------------------------------------------------------------------------
# Fused kernel body: whole per-sample forward, unrolled over layers at trace time.
# refs = (x_ref, param_refs... , out_ref, pad_scratch_refs...)
# ---------------------------------------------------------------------------
def _make_fused_kernel(plan, n_params, n_scratch):
    def kernel(*refs):
        x_ref = refs[0]
        param_refs = refs[1:1 + n_params]
        out_ref = refs[1 + n_params]
        scratch_refs = refs[2 + n_params:]
        assert len(scratch_refs) == n_scratch            # trace-time sanity

        act = x_ref[0]                                   # (T0, C0) f32, one sample
        pi = 0
        si = 0
        for kind, cfg in plan:
            w_ref = param_refs[pi]                       # bf16 weights
            b_ref = param_refs[pi + 1]                   # f32 bias (1, d_out)
            pi += 2

            if kind == "conv":
                pad_ref = scratch_refs[si]               # (T_in + 2*pad, Cin) f32
                si += 1
                pad_ref[...] = jnp.zeros_like(pad_ref)
                pad_ref[cfg["pad"]:cfg["pad"] + cfg["t_in"], :] = act
                taps = []
                for k in range(cfg["k"]):
                    if cfg["stride"] == 1:
                        taps.append(pad_ref[k:k + cfg["t_out"], :])
                    else:
                        taps.append(pad_ref[pl.ds(k, cfg["t_out"], cfg["stride"]), :])
                patch = jnp.concatenate(taps, axis=-1)   # (T_out, K*Cin) f32
                y = jnp.dot(patch.astype(jnp.bfloat16), w_ref[...],
                            preferred_element_type=jnp.float32)
            elif kind == "fc0":
                # PyTorch (C, T) flatten folded into column order t*C + c; W0 rows
                # were permuted host-side to match, so this is ONE matmul.
                rows = [act[t:t + 1, :] for t in range(cfg["t"])]
                fc_in = jnp.concatenate(rows, axis=-1)   # (1, T*C) f32
                y = jnp.dot(fc_in.astype(jnp.bfloat16), w_ref[...],
                            preferred_element_type=jnp.float32)
            else:  # plain FC layer
                y = jnp.dot(act.astype(jnp.bfloat16), w_ref[...],
                            preferred_element_type=jnp.float32)

            y = y + b_ref[...]                           # f32 bias broadcast
            if cfg["relu"]:
                y = jnp.maximum(y, 0.0)                  # f32 epilogue (v5e-safe)
            act = y

        assert pi == n_params and si == n_scratch        # trace-time sanity
        out_ref[0] = act.astype(out_ref.dtype)           # (1, d_out)
    return kernel


# ---------------------------------------------------------------------------
# Parameter construction (deterministic, synthetic) — same layout as before.
# Conv weights stored as (K, Cin, Cout) == PyTorch (Cout, Cin, K) transposed;
# FC weights as (d_in, d_out) with FC0 rows in the PyTorch flatten order c*T + t.
# ---------------------------------------------------------------------------
def init_decoder_params(key, in_samples, in_channels, block_channels, fc_features):
    num_blocks = len(block_channels)
    keys = iter(jax.random.split(key, 4 * num_blocks + 2 * len(fc_features) + 4))
    params = {"blocks": [], "pooling": [], "fc": []}

    # Blocks: Conv1d(k=3, pad=1) + ReLU
    for i in range(num_blocks):
        cin = in_channels if i == 0 else block_channels[i]
        cout = block_channels[i]
        scale = 1.0 / jnp.sqrt(3.0 * cin)
        w = jax.random.normal(next(keys), (3, cin, cout), jnp.float32) * scale
        bb = jax.random.normal(next(keys), (cout,), jnp.float32) * scale
        params["blocks"].append({"w": w, "b": bb})

    # Pooling: BlurConv1d(k=3, stride=2, pad=1) — binomial blur x channel mix.
    blur = jnp.array([0.25, 0.5, 0.25], jnp.float32)
    for c_in, c_out in zip(block_channels[:-1], block_channels[1:]):
        mix = jax.random.normal(next(keys), (c_in, c_out), jnp.float32) / jnp.sqrt(c_in)
        w = blur[:, None, None] * mix[None, :, :]          # (3, c_in, c_out)
        params["pooling"].append({"w": w, "b": jnp.zeros((c_out,), jnp.float32)})

    # Fully connected layers.
    out_samples = int(in_samples / 2 ** (num_blocks - 1))
    fc_in = out_samples * block_channels[-1]
    dims = [fc_in] + list(fc_features)
    for d_in, d_out in zip(dims[:-1], dims[1:]):
        scale = 1.0 / jnp.sqrt(float(d_in))
        w = jax.random.normal(next(keys), (d_in, d_out), jnp.float32) * scale
        bb = jax.random.normal(next(keys), (d_out,), jnp.float32) * scale
        params["fc"].append({"w": w, "b": bb})
    return params


# ---------------------------------------------------------------------------
# Build the fused forward: one pallas_call, grid over batch ("parallel").
# ---------------------------------------------------------------------------
def make_fused_decoder(params, batch, in_samples, in_channels, block_channels,
                       fc_features):
    n = batch
    plan = []
    param_arrays = []
    scratch_shapes = []
    flops = 0

    # Conv layer plan, mirroring the module's forward:
    #   blocks[0]; then for each (pool, block): pool (no relu) then block (relu).
    conv_layers = [(params["blocks"][0], 1, 1, True)]
    for pool, blk in zip(params["pooling"], params["blocks"][1:]):
        conv_layers.append((pool, 2, 1, False))
        conv_layers.append((blk, 1, 1, True))

    t, c = in_samples, in_channels
    for p, stride, pad, relu in conv_layers:
        w = p["w"]                                         # (K, Cin, Cout)
        k, cin, cout = w.shape
        assert cin == c, (cin, c)
        t_out = (t + 2 * pad - k) // stride + 1
        plan.append(("conv", dict(k=k, cin=cin, cout=cout, t_in=t, t_out=t_out,
                                  stride=stride, pad=pad, relu=relu)))
        # Weight rows in patch column order k*Cin + c; bf16 for the MXU.
        param_arrays += [jnp.asarray(w.reshape(k * cin, cout), jnp.bfloat16),
                         p["b"].reshape(1, cout).astype(jnp.float32)]
        scratch_shapes.append(pltpu.VMEM((t + 2 * pad, cin), jnp.float32))
        flops += 2 * n * t_out * (k * cin) * cout
        t, c = t_out, cout

    # FC0: fold the PyTorch (N, C, T) -> (N, C*T) flatten into a one-time host-side
    # row permutation of W0 (c*T + t  ->  t*C + c); in-kernel it is ONE matmul.
    n_fc = len(params["fc"])
    fc0 = params["fc"][0]
    w0 = fc0["w"]                                          # (C*T, F0), rows c*T + t
    f0 = w0.shape[1]
    assert w0.shape[0] == c * t, (w0.shape, c, t)
    w0p = w0.reshape(c, t, f0).transpose(1, 0, 2).reshape(t * c, f0)   # rows t*C + c
    plan.append(("fc0", dict(t=t, c=c, f=f0, relu=(n_fc > 1))))
    param_arrays += [jnp.asarray(w0p, jnp.bfloat16),
                     fc0["b"].reshape(1, f0).astype(jnp.float32)]
    flops += 2 * n * (t * c) * f0
    d = f0

    # Remaining FC layers: plain matmuls.
    for i, fc in enumerate(params["fc"][1:], start=1):
        w = fc["w"]
        d_in, d_out = w.shape
        assert d_in == d, (d_in, d)
        plan.append(("fc", dict(d_in=d_in, d_out=d_out, relu=(i < n_fc - 1))))
        param_arrays += [jnp.asarray(w, jnp.bfloat16),
                         fc["b"].reshape(1, d_out).astype(jnp.float32)]
        flops += 2 * n * d_in * d_out
        d = d_out

    n_params = len(param_arrays)

    # Block specs: x tiled per sample; weights/biases whole-array blocks.
    in_specs = [pl.BlockSpec((1, in_samples, in_channels), lambda b: (b, 0, 0))]
    for arr in param_arrays:
        in_specs.append(pl.BlockSpec(arr.shape, lambda b, _nd=arr.ndim: (0,) * _nd))
    # Output kept 3-D (N, 1, d) so the block's last two dims equal the array dims.
    out_shape = jax.ShapeDtypeStruct((n, 1, d), jnp.float32)
    out_spec = pl.BlockSpec((1, 1, d), lambda b: (b, 0, 0))

    bytes_accessed = (4 * n * in_samples * in_channels
                      + sum(int(a.size) * a.dtype.itemsize for a in param_arrays)
                      + 4 * n * d)

    fwd = pl.pallas_call(
        _make_fused_kernel(tuple(plan), n_params, len(scratch_shapes)),
        out_shape=out_shape,
        grid=(n,),
        in_specs=in_specs,
        out_specs=out_spec,
        scratch_shapes=scratch_shapes,
        compiler_params=pltpu.CompilerParams(
            dimension_semantics=("parallel",),          # 2nd TC on v7x; no-op v5e/v6e
            vmem_limit_bytes=32 * 1024 * 1024),
        cost_estimate=pl.CostEstimate(flops=int(flops), transcendentals=0,
                                      bytes_accessed=int(bytes_accessed)),
    )

    @jax.jit
    def forward(x_nct):
        # Boundary layout adaptation only: NCT -> NTC (time on sublanes, channels
        # on lanes).  Tiny one-time XLA op outside the kernel.
        x_ntc = jnp.transpose(x_nct, (0, 2, 1))
        out = fwd(x_ntc, *param_arrays)
        return out[:, 0, :]

    return forward


# ---------------------------------------------------------------------------
# Pure-JAX reference (same math as the PyTorch module) for a correctness check.
# ---------------------------------------------------------------------------
def _reference_forward(x_nct, params):
    x = jnp.transpose(x_nct, (0, 2, 1))                    # NCT -> NTC

    def conv(x, w, b, stride, pad, relu):
        N, T, Cin = x.shape
        K, _, Cout = w.shape
        xp = jnp.pad(x, ((0, 0), (pad, pad), (0, 0)))
        T_out = (T + 2 * pad - K) // stride + 1
        cols = [xp[:, k:k + stride * T_out:stride, :] for k in range(K)]
        patches = jnp.concatenate(cols, axis=-1).reshape(N * T_out, K * Cin)
        out = patches @ w.reshape(K * Cin, Cout) + b
        if relu:
            out = jnp.maximum(out, 0.0)
        return out.reshape(N, T_out, Cout)

    blk0 = params["blocks"][0]
    x = conv(x, blk0["w"], blk0["b"], 1, 1, True)
    for pool, blk in zip(params["pooling"], params["blocks"][1:]):
        x = conv(x, pool["w"], pool["b"], 2, 1, False)
        x = conv(x, blk["w"], blk["b"], 1, 1, True)
    N, T, C = x.shape
    x = jnp.transpose(x, (0, 2, 1)).reshape(N, C * T)      # PyTorch NCT flatten order
    n_fc = len(params["fc"])
    for i, fc in enumerate(params["fc"]):
        x = x @ fc["w"] + fc["b"]
        if i < n_fc - 1:
            x = jnp.maximum(x, 0.0)
    return x


if __name__ == "__main__":
    # Small, module-consistent shapes.
    batch = 2
    in_channels = 4
    in_samples = 16
    block_channels = (8, 16)
    fully_connected_features = (32, 8)

    key = jax.random.PRNGKey(0)
    k_params, k_x = jax.random.split(key)
    params = init_decoder_params(
        k_params, in_samples, in_channels, block_channels, fully_connected_features
    )
    # PyTorch-style NCT input: (N, C, T)
    x = jax.random.normal(k_x, (batch, in_channels, in_samples), jnp.float32)

    forward = make_fused_decoder(
        params, batch, in_samples, in_channels, block_channels,
        fully_connected_features
    )
    out = jax.block_until_ready(forward(x))

    assert out.shape == (batch, fully_connected_features[-1]), out.shape
    assert bool(jnp.all(jnp.isfinite(out)))

    # Correctness vs the pure-JAX reference (tolerance absorbs bf16 MXU operands).
    ref = jax.block_until_ready(_reference_forward(x, params))
    scale = float(jnp.max(jnp.abs(ref))) + 1e-6
    max_err = float(jnp.max(jnp.abs(out - ref)))
    assert max_err <= 5e-2 * scale + 1e-3, (max_err, scale)

    print("KERNEL_OK")
</pallas_src>

<mosaic_0001>
module attributes {stable_mosaic.version = 11 : i64} {
  func.func @kernel(%arg0: i32, %arg1: memref<1x16x4xf32, #tpu.memory_space<vmem>>, %arg2: memref<12x8xbf16, #tpu.memory_space<vmem>>, %arg3: memref<1x8xf32, #tpu.memory_space<vmem>>, %arg4: memref<24x16xbf16, #tpu.memory_space<vmem>>, %arg5: memref<1x16xf32, #tpu.memory_space<vmem>>, %arg6: memref<48x16xbf16, #tpu.memory_space<vmem>>, %arg7: memref<1x16xf32, #tpu.memory_space<vmem>>, %arg8: memref<128x32xbf16, #tpu.memory_space<vmem>>, %arg9: memref<1x32xf32, #tpu.memory_space<vmem>>, %arg10: memref<32x8xbf16, #tpu.memory_space<vmem>>, %arg11: memref<1x8xf32, #tpu.memory_space<vmem>>, %arg12: memref<1x1x8xf32, #tpu.memory_space<vmem>>, %arg13: memref<18x4xf32, #tpu.memory_space<vmem>>, %arg14: memref<18x8xf32, #tpu.memory_space<vmem>>, %arg15: memref<10x16xf32, #tpu.memory_space<vmem>>) attributes {dimension_semantics = [#tpu.dimension_semantics<parallel>], iteration_bounds = array<i64: 2>, scalar_prefetch = 0 : i64, scratch_operands = 3 : i64, tpu.core_type = #tpu.core_type<tc>, window_params = [{transform_indices = @transform_0, window_bounds = array<i64: 1, 16, 4>}, {pipeline_mode = #tpu.pipeline_mode<synchronous>, transform_indices = @transform_1, window_bounds = array<i64: 12, 8>}, {pipeline_mode = #tpu.pipeline_mode<synchronous>, transform_indices = @transform_2, window_bounds = array<i64: 1, 8>}, {pipeline_mode = #tpu.pipeline_mode<synchronous>, transform_indices = @transform_3, window_bounds = array<i64: 24, 16>}, {pipeline_mode = #tpu.pipeline_mode<synchronous>, transform_indices = @transform_4, window_bounds = array<i64: 1, 16>}, {pipeline_mode = #tpu.pipeline_mode<synchronous>, transform_indices = @transform_5, window_bounds = array<i64: 48, 16>}, {pipeline_mode = #tpu.pipeline_mode<synchronous>, transform_indices = @transform_6, window_bounds = array<i64: 1, 16>}, {pipeline_mode = #tpu.pipeline_mode<synchronous>, transform_indices = @transform_7, window_bounds = array<i64: 128, 32>}, {pipeline_mode = #tpu.pipeline_mode<synchronous>, transform_indices = @transform_8, window_bounds = array<i64: 1, 32>}, {pipeline_mode = #tpu.pipeline_mode<synchronous>, transform_indices = @transform_9, window_bounds = array<i64: 32, 8>}, {pipeline_mode = #tpu.pipeline_mode<synchronous>, transform_indices = @transform_10, window_bounds = array<i64: 1, 8>}, {transform_indices = @transform_11, window_bounds = array<i64: 1, 1, 8>}]} {
    %c0 = arith.constant 0 : index
    %c0_0 = arith.constant 0 : index
    %c0_1 = arith.constant 0 : index
    %0 = vector.load %arg1[%c0, %c0_0, %c0_1] : memref<1x16x4xf32, #tpu.memory_space<vmem>>, vector<1x16x4xf32>
    %1 = vector.shape_cast %0 : vector<1x16x4xf32> to vector<16x4xf32>
    %cst = arith.constant 0.000000e+00 : f32
    %2 = vector.broadcast %cst : f32 to vector<18x4xf32>
    %c0_2 = arith.constant 0 : index
    %c0_3 = arith.constant 0 : index
    %3 = vector.load %arg13[%c0_2, %c0_3] : memref<18x4xf32, #tpu.memory_space<vmem>>, vector<18x4xf32>
    tpu.vector_store %arg13[%c0_2, %c0_3], %2 {strides = array<i32>} : memref<18x4xf32, #tpu.memory_space<vmem>>, vector<18x4xf32>,
    %c1 = arith.constant 1 : index
    %c0_4 = arith.constant 0 : index
    %4 = vector.load %arg13[%c1, %c0_4] : memref<18x4xf32, #tpu.memory_space<vmem>>, vector<16x4xf32>
    tpu.vector_store %arg13[%c1, %c0_4], %1 {strides = array<i32>} : memref<18x4xf32, #tpu.memory_space<vmem>>, vector<16x4xf32>,
    %c0_5 = arith.constant 0 : index
    %c0_6 = arith.constant 0 : index
    %5 = vector.load %arg13[%c0_5, %c0_6] : memref<18x4xf32, #tpu.memory_space<vmem>>, vector<16x4xf32>
    %c1_7 = arith.constant 1 : index
    %c0_8 = arith.constant 0 : index
    %6 = vector.load %arg13[%c1_7, %c0_8] : memref<18x4xf32, #tpu.memory_space<vmem>>, vector<16x4xf32>
    %c2 = arith.constant 2 : index
    %c0_9 = arith.constant 0 : index
    %7 = vector.load %arg13[%c2, %c0_9] : memref<18x4xf32, #tpu.memory_space<vmem>>, vector<16x4xf32>
    %8 = tpu.concatenate %5, %6, %7 in 1 : vector<16x4xf32>, vector<16x4xf32>, vector<16x4xf32> -> vector<16x12xf32>
    %9 = arith.truncf %8 : vector<16x12xf32> to vector<16x12xbf16>
    %c0_10 = arith.constant 0 : index
    %c0_11 = arith.constant 0 : index
    %10 = vector.load %arg2[%c0_10, %c0_11] : memref<12x8xbf16, #tpu.memory_space<vmem>>, vector<12x8xbf16>
    %cst_12 = arith.constant dense<0.000000e+00> : vector<16x8xf32>
    %11 = tpu.matmul %9, %10, %cst_12 {dimension_numbers = #tpu.dot_dimension_numbers<[1], [0], [0], [1], [0, 0, 1, 1], [], []>} : vector<16x12xbf16>, vector<12x8xbf16>, vector<16x8xf32> -> vector<16x8xf32>
    %c0_13 = arith.constant 0 : index
    %c0_14 = arith.constant 0 : index
    %12 = vector.load %arg3[%c0_13, %c0_14] : memref<1x8xf32, #tpu.memory_space<vmem>>, vector<1x8xf32>
    %13 = vector.broadcast %12 : vector<1x8xf32> to vector<16x8xf32>
    %14 = arith.addf %11, %13 : vector<16x8xf32>
    %cst_15 = arith.constant 0.000000e+00 : f32
    %15 = vector.broadcast %cst_15 : f32 to vector<16x8xf32>
    %16 = arith.maximumf %14, %15 : vector<16x8xf32>
    %cst_16 = arith.constant 0.000000e+00 : f32
    %17 = vector.broadcast %cst_16 : f32 to vector<18x8xf32>
    %c0_17 = arith.constant 0 : index
    %c0_18 = arith.constant 0 : index
    %18 = vector.load %arg14[%c0_17, %c0_18] : memref<18x8xf32, #tpu.memory_space<vmem>>, vector<18x8xf32>
    tpu.vector_store %arg14[%c0_17, %c0_18], %17 {strides = array<i32>} : memref<18x8xf32, #tpu.memory_space<vmem>>, vector<18x8xf32>,
    %c1_19 = arith.constant 1 : index
    %c0_20 = arith.constant 0 : index
    %19 = vector.load %arg14[%c1_19, %c0_20] : memref<18x8xf32, #tpu.memory_space<vmem>>, vector<16x8xf32>
    tpu.vector_store %arg14[%c1_19, %c0_20], %16 {strides = array<i32>} : memref<18x8xf32, #tpu.memory_space<vmem>>, vector<16x8xf32>,
    %c0_21 = arith.constant 0 : index
    %c0_22 = arith.constant 0 : index
    %20 = tpu.strided_load %arg14[%c0_21, %c0_22] {strides = array<i32: 2, 1>} : memref<18x8xf32, #tpu.memory_space<vmem>>, vector<8x8xf32>
    %c1_23 = arith.constant 1 : index
    %c0_24 = arith.constant 0 : index
    %21 = tpu.strided_load %arg14[%c1_23, %c0_24] {strides = array<i32: 2, 1>} : memref<18x8xf32, #tpu.memory_space<vmem>>, vector<8x8xf32>
    %c2_25 = arith.constant 2 : index
    %c0_26 = arith.constant 0 : index
    %22 = tpu.strided_load %arg14[%c2_25, %c0_26] {strides = array<i32: 2, 1>} : memref<18x8xf32, #tpu.memory_space<vmem>>, vector<8x8xf32>
    %23 = tpu.concatenate %20, %21, %22 in 1 : vector<8x8xf32>, vector<8x8xf32>, vector<8x8xf32> -> vector<8x24xf32>
    %24 = arith.truncf %23 : vector<8x24xf32> to vector<8x24xbf16>
    %c0_27 = arith.constant 0 : index
    %c0_28 = arith.constant 0 : index
    %25 = vector.load %arg4[%c0_27, %c0_28] : memref<24x16xbf16, #tpu.memory_space<vmem>>, vector<24x16xbf16>
    %cst_29 = arith.constant dense<0.000000e+00> : vector<8x16xf32>
    %26 = tpu.matmul %24, %25, %cst_29 {dimension_numbers = #tpu.dot_dimension_numbers<[1], [0], [0], [1], [0, 0, 1, 1], [], []>} : vector<8x24xbf16>, vector<24x16xbf16>, vector<8x16xf32> -> vector<8x16xf32>
    %c0_30 = arith.constant 0 : index
    %c0_31 = arith.constant 0 : index
    %27 = vector.load %arg5[%c0_30, %c0_31] : memref<1x16xf32, #tpu.memory_space<vmem>>, vector<1x16xf32>
    %28 = vector.broadcast %27 : vector<1x16xf32> to vector<8x16xf32>
    %29 = arith.addf %26, %28 : vector<8x16xf32>
    %cst_32 = arith.constant 0.000000e+00 : f32
    %30 = vector.broadcast %cst_32 : f32 to vector<10x16xf32>
    %c0_33 = arith.constant 0 : index
    %c0_34 = arith.constant 0 : index
    %31 = vector.load %arg15[%c0_33, %c0_34] : memref<10x16xf32, #tpu.memory_space<vmem>>, vector<10x16xf32>
    tpu.vector_store %arg15[%c0_33, %c0_34], %30 {strides = array<i32>} : memref<10x16xf32, #tpu.memory_space<vmem>>, vector<10x16xf32>,
    %c1_35 = arith.constant 1 : index
    %c0_36 = arith.constant 0 : index
    %32 = vector.load %arg15[%c1_35, %c0_36] : memref<10x16xf32, #tpu.memory_space<vmem>>, vector<8x16xf32>
    tpu.vector_store %arg15[%c1_35, %c0_36], %29 {strides = array<i32>} : memref<10x16xf32, #tpu.memory_space<vmem>>, vector<8x16xf32>,
    %c0_37 = arith.constant 0 : index
    %c0_38 = arith.constant 0 : index
    %33 = vector.load %arg15[%c0_37, %c0_38] : memref<10x16xf32, #tpu.memory_space<vmem>>, vector<8x16xf32>
    %c1_39 = arith.constant 1 : index
    %c0_40 = arith.constant 0 : index
    %34 = vector.load %arg15[%c1_39, %c0_40] : memref<10x16xf32, #tpu.memory_space<vmem>>, vector<8x16xf32>
    %c2_41 = arith.constant 2 : index
    %c0_42 = arith.constant 0 : index
    %35 = vector.load %arg15[%c2_41, %c0_42] : memref<10x16xf32, #tpu.memory_space<vmem>>, vector<8x16xf32>
    %36 = tpu.concatenate %33, %34, %35 in 1 : vector<8x16xf32>, vector<8x16xf32>, vector<8x16xf32> -> vector<8x48xf32>
    %37 = arith.truncf %36 : vector<8x48xf32> to vector<8x48xbf16>
    %c0_43 = arith.constant 0 : index
    %c0_44 = arith.constant 0 : index
    %38 = vector.load %arg6[%c0_43, %c0_44] : memref<48x16xbf16, #tpu.memory_space<vmem>>, vector<48x16xbf16>
    %cst_45 = arith.constant dense<0.000000e+00> : vector<8x16xf32>
    %39 = tpu.matmul %37, %38, %cst_45 {dimension_numbers = #tpu.dot_dimension_numbers<[1], [0], [0], [1], [0, 0, 1, 1], [], []>} : vector<8x48xbf16>, vector<48x16xbf16>, vector<8x16xf32> -> vector<8x16xf32>
    %c0_46 = arith.constant 0 : index
    %c0_47 = arith.constant 0 : index
    %40 = vector.load %arg7[%c0_46, %c0_47] : memref<1x16xf32, #tpu.memory_space<vmem>>, vector<1x16xf32>
    %41 = vector.broadcast %40 : vector<1x16xf32> to vector<8x16xf32>
    %42 = arith.addf %39, %41 : vector<8x16xf32>
    %cst_48 = arith.constant 0.000000e+00 : f32
    %43 = vector.broadcast %cst_48 : f32 to vector<8x16xf32>
    %44 = arith.maximumf %42, %43 : vector<8x16xf32>
    %45 = vector.extract_strided_slice %44 {offsets = [0, 0], sizes = [1, 16], strides = [1, 1]} : vector<8x16xf32> to vector<1x16xf32>
    %46 = vector.extract_strided_slice %44 {offsets = [1, 0], sizes = [1, 16], strides = [1, 1]} : vector<8x16xf32> to vector<1x16xf32>
    %47 = vector.extract_strided_slice %44 {offsets = [2, 0], sizes = [1, 16], strides = [1, 1]} : vector<8x16xf32> to vector<1x16xf32>
    %48 = vector.extract_strided_slice %44 {offsets = [3, 0], sizes = [1, 16], strides = [1, 1]} : vector<8x16xf32> to vector<1x16xf32>
    %49 = vector.extract_strided_slice %44 {offsets = [4, 0], sizes = [1, 16], strides = [1, 1]} : vector<8x16xf32> to vector<1x16xf32>
    %50 = vector.extract_strided_slice %44 {offsets = [5, 0], sizes = [1, 16], strides = [1, 1]} : vector<8x16xf32> to vector<1x16xf32>
    %51 = vector.extract_strided_slice %44 {offsets = [6, 0], sizes = [1, 16], strides = [1, 1]} : vector<8x16xf32> to vector<1x16xf32>
    %52 = vector.extract_strided_slice %44 {offsets = [7, 0], sizes = [1, 16], strides = [1, 1]} : vector<8x16xf32> to vector<1x16xf32>
    %53 = tpu.concatenate %45, %46, %47, %48, %49, %50, %51, %52 in 1 : vector<1x16xf32>, vector<1x16xf32>, vector<1x16xf32>, vector<1x16xf32>, vector<1x16xf32>, vector<1x16xf32>, vector<1x16xf32>, vector<1x16xf32> -> vector<1x128xf32>
    %54 = arith.truncf %53 : vector<1x128xf32> to vector<1x128xbf16>
    %c0_49 = arith.constant 0 : index
    %c0_50 = arith.constant 0 : index
    %55 = vector.load %arg8[%c0_49, %c0_50] : memref<128x32xbf16, #tpu.memory_space<vmem>>, vector<128x32xbf16>
    %cst_51 = arith.constant dense<0.000000e+00> : vector<1x32xf32>
    %56 = tpu.matmul %54, %55, %cst_51 {dimension_numbers = #tpu.dot_dimension_numbers<[1], [0], [0], [1], [0, 0, 1, 1], [], []>} : vector<1x128xbf16>, vector<128x32xbf16>, vector<1x32xf32> -> vector<1x32xf32>
    %c0_52 = arith.constant 0 : index
    %c0_53 = arith.constant 0 : index
    %57 = vector.load %arg9[%c0_52, %c0_53] : memref<1x32xf32, #tpu.memory_space<vmem>>, vector<1x32xf32>
    %58 = arith.addf %56, %57 : vector<1x32xf32>
    %cst_54 = arith.constant 0.000000e+00 : f32
    %59 = vector.broadcast %cst_54 : f32 to vector<1x32xf32>
    %60 = arith.maximumf %58, %59 : vector<1x32xf32>
    %61 = arith.truncf %60 : vector<1x32xf32> to vector<1x32xbf16>
    %c0_55 = arith.constant 0 : index
    %c0_56 = arith.constant 0 : index
    %62 = vector.load %arg10[%c0_55, %c0_56] : memref<32x8xbf16, #tpu.memory_space<vmem>>, vector<32x8xbf16>
    %cst_57 = arith.constant dense<0.000000e+00> : vector<1x8xf32>
    %63 = tpu.matmul %61, %62, %cst_57 {dimension_numbers = #tpu.dot_dimension_numbers<[1], [0], [0], [1], [0, 0, 1, 1], [], []>} : vector<1x32xbf16>, vector<32x8xbf16>, vector<1x8xf32> -> vector<1x8xf32>
    %c0_58 = arith.constant 0 : index
    %c0_59 = arith.constant 0 : index
    %64 = vector.load %arg11[%c0_58, %c0_59] : memref<1x8xf32, #tpu.memory_space<vmem>>, vector<1x8xf32>
    %65 = arith.addf %63, %64 : vector<1x8xf32>
    %c0_60 = arith.constant 0 : index
    %c0_61 = arith.constant 0 : index
    %c0_62 = arith.constant 0 : index
    %66 = vector.load %arg12[%c0_60, %c0_61, %c0_62] : memref<1x1x8xf32, #tpu.memory_space<vmem>>, vector<1x1x8xf32>
    %67 = vector.shape_cast %66 : vector<1x1x8xf32> to vector<1x8xf32>
    %68 = vector.shape_cast %65 : vector<1x8xf32> to vector<1x1x8xf32>
    tpu.vector_store %arg12[%c0_60, %c0_61, %c0_62], %68 {strides = array<i32>} : memref<1x1x8xf32, #tpu.memory_space<vmem>>, vector<1x1x8xf32>,
    return
  }
  func.func @transform_0(%arg0: i32) -> (i32, i32, i32) {
    %c0_i32 = arith.constant 0 : i32
    %c0_i32_0 = arith.constant 0 : i32
    %c0_i32_1 = arith.constant 0 : i32
    return %arg0, %c0_i32, %c0_i32_0 : i32, i32, i32
  }
  func.func @transform_1(%arg0: i32) -> (i32, i32) {
    %c0_i32 = arith.constant 0 : i32
    %c0_i32_0 = arith.constant 0 : i32
    %c0_i32_1 = arith.constant 0 : i32
    return %c0_i32, %c0_i32_0 : i32, i32
  }
  func.func @transform_2(%arg0: i32) -> (i32, i32) {
    %c0_i32 = arith.constant 0 : i32
    %c0_i32_0 = arith.constant 0 : i32
    %c0_i32_1 = arith.constant 0 : i32
    return %c0_i32, %c0_i32_0 : i32, i32
  }
  func.func @transform_3(%arg0: i32) -> (i32, i32) {
    %c0_i32 = arith.constant 0 : i32
    %c0_i32_0 = arith.constant 0 : i32
    %c0_i32_1 = arith.constant 0 : i32
    return %c0_i32, %c0_i32_0 : i32, i32
  }
  func.func @transform_4(%arg0: i32) -> (i32, i32) {
    %c0_i32 = arith.constant 0 : i32
    %c0_i32_0 = arith.constant 0 : i32
    %c0_i32_1 = arith.constant 0 : i32
    return %c0_i32, %c0_i32_0 : i32, i32
  }
  func.func @transform_5(%arg0: i32) -> (i32, i32) {
    %c0_i32 = arith.constant 0 : i32
    %c0_i32_0 = arith.constant 0 : i32
    %c0_i32_1 = arith.constant 0 : i32
    return %c0_i32, %c0_i32_0 : i32, i32
  }
  func.func @transform_6(%arg0: i32) -> (i32, i32) {
    %c0_i32 = arith.constant 0 : i32
    %c0_i32_0 = arith.constant 0 : i32
    %c0_i32_1 = arith.constant 0 : i32
    return %c0_i32, %c0_i32_0 : i32, i32
  }
  func.func @transform_7(%arg0: i32) -> (i32, i32) {
    %c0_i32 = arith.constant 0 : i32
    %c0_i32_0 = arith.constant 0 : i32
    %c0_i32_1 = arith.constant 0 : i32
    return %c0_i32, %c0_i32_0 : i32, i32
  }
  func.func @transform_8(%arg0: i32) -> (i32, i32) {
    %c0_i32 = arith.constant 0 : i32
    %c0_i32_0 = arith.constant 0 : i32
    %c0_i32_1 = arith.constant 0 : i32
    return %c0_i32, %c0_i32_0 : i32, i32
  }
  func.func @transform_9(%arg0: i32) -> (i32, i32) {
    %c0_i32 = arith.constant 0 : i32
    %c0_i32_0 = arith.constant 0 : i32
    %c0_i32_1 = arith.constant 0 : i32
    return %c0_i32, %c0_i32_0 : i32, i32
  }
  func.func @transform_10(%arg0: i32) -> (i32, i32) {
    %c0_i32 = arith.constant 0 : i32
    %c0_i32_0 = arith.constant 0 : i32
    %c0_i32_1 = arith.constant 0 : i32
    return %c0_i32, %c0_i32_0 : i32, i32
  }
  func.func @transform_11(%arg0: i32) -> (i32, i32, i32) {
    %c0_i32 = arith.constant 0 : i32
    %c0_i32_0 = arith.constant 0 : i32
    %c0_i32_1 = arith.constant 0 : i32
    return %arg0, %c0_i32, %c0_i32_0 : i32, i32, i32
  }
}

</mosaic_0001>

<bundles_post_ra>
// kernel: forward.1
= control target key start
LH: loop header
LB: loop body
LE: loop exit
PB: predicated region body
PF: predicated region fallthrough
CT: control target
= control target key end

     0   :  { %s1502_s0 = inlined_call_operand.vmem [shape: f32[2,16,4], index: 0, kind: input, shape index: {}]   ;;  %s1503_s1 = inlined_call_operand.hbm [shape: bf16[12,8], index: 1, kind: input, shape index: {}]   ;;  %s1504_s2 = inlined_call_operand.vmem [shape: f32[1,8], index: 2, kind: input, shape index: {}]   ;;  %s1505_s3 = inlined_call_operand.hbm [shape: bf16[24,16], index: 3, kind: input, shape index: {}]   ;;  %s1506_s4 = inlined_call_operand.vmem [shape: f32[1,16], index: 4, kind: input, shape index: {}]   ;;  %s1507_s5 = inlined_call_operand.vmem [shape: bf16[48,16], index: 5, kind: input, shape index: {}]   ;;  %s1508_s6 = inlined_call_operand.vmem [shape: f32[1,16], index: 6, kind: input, shape index: {}]   ;;  %s1509_s7 = inlined_call_operand.hbm [shape: bf16[128,32], index: 7, kind: input, shape index: {}]   ;;  %s1510_s8 = inlined_call_operand.vmem [shape: f32[1,32], index: 8, kind: input, shape index: {}]   ;;  %s1511_s9 = inlined_call_operand.vmem [shape: bf16[32,8], index: 9, kind: input, shape index: {}]   ;;  %s1512_s10 = inlined_call_operand.vmem [shape: f32[1,8], index: 10, kind: input, shape index: {}]   ;;  %s1513_s11 = inlined_call_operand.hbm [shape: f32[2,1,8], index: 11, kind: output, shape index: {}]  }
   0x1   :  { %1517 = sst [smem:[#allocation18_spill]] %s1503_s1 }
   0x2   :  { %1518 = sst [smem:[#allocation19_spill]] %s1505_s3 }
   0x3   :  { %16 = vsyncpa [#allocation6], 0 }
   0x4   :  { %17 = vsyncpa [#allocation9], 0 }
   0x5   :  { %18 = vsyncpa [#allocation7], 0 }
   0x6   :  { %20 = vsyncpa [#allocation7 + $0x1], 0  ;;  %s1313_s17 = smov 0   ;;  %s1315_s18 = smov 0  }
   0x7   :  { %s1317_s19 = smov 0   ;;  %s1319_s20 = smov 0  }
   0x8 LB: > { %1519 = sst [smem:[#allocation15_spill]] %s1232_s19  ;;  %s1334_s21 = sadd.s32 4294967295, %s1236_s20   ;;  %s1236_s20 = sphi %s1319_s20, %s1528_s20   ;;  %s1232_s19 = sphi %s1317_s19, %s1530_s19   ;;  %s1228_s18 = sphi %s1315_s18, %s1532_s18   ;;  %s1224_s17 = sphi %s1313_s17, %s1531_s17  }
   0x9   : > { %s887_s22 = sadd.s32 4294967294, %s1236_s20   ;;  %s1338_s23 = sadd.s32 1, %s1236_s20  }
   0xa   : > { %1520 = sst [smem:[#allocation16_spill]] %s1338_s23  ;;  %s269_s24 = sadd.s32 1, %s1232_s19 }
   0xb   : > { %s266_s25 = ssub.s32 %s1236_s20, %s1338_s23  ;;  %p279_p0 = scmp.ne.s32.totalorder %s1232_s19, %s1228_s18 }
   0xc   : > { %p267_p1 = scmp.eq.s32.totalorder %s266_s25, 0  ;;  %p280_p2 = scmp.eq.s32.totalorder %s1334_s21, 1 }
   0xd   : > { %p285_p3 = scmp.ne.s32.totalorder %s1228_s18, %s1224_s17  ;;  %p286_p4 = scmp.eq.s32.totalorder %s887_s22, 1 }
   0xe   : > { %s1349_s26 = scalar_select %p267_p1, %s1232_s19, %s269_s24  }
   0xf   : > { %p1351_p5 = por %p280_p2, %p279_p0  ;;  %p1355_p6 = por %p286_p4, %p285_p3 }
  0x10   : > { %1521 = sst [smem:[#allocation17_spill]] %s1349_s26  ;;  %p888_p7 = scmp.ge.s32.totalorder %s1236_s20, 1 }
  0x11   : > { %p293_p8 = scmp.lt.s32.totalorder %s1236_s20, 3  ;;  %p1009_p9 = scmp.eq.s32.totalorder %s1334_s21, 0 }
  0x12   : > { %s1525_s3 = sld [smem:[#allocation19_spill]]  ;;  %s1238_s24 = smov [#allocation8]  }
  0x13   : > { %p1362_p10 = pnand %p888_p7, %p293_p8  ;;  %s1526_s1 = sld [smem:[#allocation18_spill]] }
  0x14   : > { %s323_s25 = sshll.u32 %s1238_s24, 4  ;;  %s1239_s30 = smov 64   ;;  %s324_s25 = int_to_ptr.vmem [resolvable:$true] %s323_s25 }
  0x15   : > { %p995_p11 = pneg %p1362_p10  ;;  %s1240_s12 = smov 4  }
  0x16   : > { %s1242_s19 = smov [#allocation10]  }
  0x17   : > { %p1376_p12 = pnand %p1009_p9, %p995_p11  ;;  %s346_s23 = sshll.u32 %s1242_s19, 4  ;;  %s347_s23 = int_to_ptr.vmem [resolvable:$true] %s346_s23 }
  0x18   : > { %s321_s13 = sshll.u32 %s1525_s3, 4  ;;  %s1241_s3 = smov [#allocation5]   ;;  %s322_s13 = int_to_ptr.hbm [resolvable:$true] %s321_s13 }
  0x19   : > { %s304_s16 = sshll.u32 %s1526_s1, 4  ;;  %s306_s26 = sshll.u32 %s1241_s3, 4  ;;  %s305_s16 = int_to_ptr.hbm [resolvable:$true] %s304_s16  ;;  %s307_s26 = int_to_ptr.vmem [resolvable:$true] %s306_s26 }
  0x1a   : > { %1001 = dma.hbm_to_vmem [thread:$0]  (!%p1376_p12), %s322_s13, 192, %s324_s25, [#allocation9], %s1239_s30, %s1239_s30, %s1240_s12  }
  0x1b   : > { %s344_s1 = sshll.u32 %s1509_s7, 4  ;;  %379 = sbr.rel (%p1362_p10) target bundleno = 1236 (0x4d4), region = 64  ;;  %s345_s1 = int_to_ptr.hbm [resolvable:$true] %s344_s1 }
  0x1c   : > { %998 = dma.hbm_to_vmem [thread:$0]  (!%p1376_p12), %s305_s16, 128, %s307_s26, [#allocation6], %s1239_s30, %s1239_s30, %s1240_s12  }
  0x1d   : > { %1004 = dma.hbm_to_vmem [thread:$0]  (!%p1376_p12), %s345_s1, 1024, %s347_s23, [#allocation9], %s1239_s30, %s1239_s30, %s1240_s12  }
  0x20   : > { %1211 = dma.done.wait (%p1009_p9), [#allocation6], 128  }
  0x21   : > { %1213 = vsyncadd (%p1009_p9), [#allocation6], 4294967168 }
  0x22   : > { %1215 = dma.done.wait (%p1009_p9), [#allocation9], 1216  }
  0x23   : > { %1217 = vsyncadd (%p1009_p9), [#allocation9], 4294966080  ;;  %p429_p13 = scmp.lt.s32.totalorder %s1334_s21, 1  ;;  %vm437_vm0 = vcmask 31744   ;;  %vm440_vm1 = vcmask 25600   ;;  %v1243_v0 = vmov 0.0  }
  0x24   : > { %438 = vst.msk [vmem:[#allocation2] sm:$0xff] %vm437_vm0, %v1243_v0  ;;  %s1244_s29 = smov 4   ;;  %s1245_s13 = smov 8   ;;  %v901_v9 = vld [vmem:[#allocation5] sm:$0xf]  ;;  %vm487_vm2 = vcmask 1045504  }
  0x25   : > { %s430_s1 = scalar_select %p429_p13, %s1334_s21, 1  ;;  %439 = vst.msk [vmem:[#allocation2 + $0x8] sm:$0xff] %vm437_vm0, %v1243_v0  ;;  %v966_v10 = vld [vmem:[#allocation5] sm:$0x30]  ;;  %vm468_vm3 = vcmask 64512   ;;  %vm483_vm4 = vcmask 97280  }
  0x26   : > { %441 = vst.msk [vmem:[#allocation2 + $0x10] sm:$0x3] %vm440_vm1, %v1243_v0  ;;  %v902_v11 = vor.u32 %v966_v10, %v901_v9  ;;  %vm509_vm5 = vcmask 58368   ;;  %v1073_v26 = vld [vmem:[%s1504_s2] ss:$0 sm:$0xff]  ;;  %s1246_s24 = smov 16  }
  0x27   : > { %s965_s3 = sshll.u32 %s430_s1, 4  ;;  %507 = vst.msk [vmem:[#allocation3] sm:$0xff] %vm468_vm3, %v1243_v0  ;;  %v532_v35 = vld [vmem:[#allocation8 + $0x8] sm:$0xf]  ;;  %vm550_vm6 = vcmask 1043456   ;;  %vm527_vm7 = vcmask 130048  }
  0x28   : > { %s433_s26 = scalar_lea.vmem %s1502_s0, %s965_s3  ;;  %v489_v12 = vsel %vm487_vm2, %v902_v11, 0  ;;  %508 = vst.msk [vmem:[#allocation3 + $0x8] sm:$0xff] %vm468_vm3, %v1243_v0  ;;  %v542_v36 = vunpack.c.l.b16 %v532_v35  ;;  %v967_v39 = vld [vmem:[#allocation8] sm:$0xff]  ;;  %vm546_vm8 = vcmask 195584   ;;  %vm568_vm9 = vcmask 123904   ;;  %s1247_s12 = smov 32  }
  0x29   : > { %v435_v1 = vld [vmem:[%s433_s26] sm:$0xff]  ;;  %v436_v2 = vld [vmem:[%s433_s26 + $0x8] sm:$0xff]  ;;  %498 = vmatpush.bf16.msra.mxu0 %v489_v12  ;;  %510 = vst.msk [vmem:[#allocation3 + $0x10] sm:$0x3] %vm509_vm5, %v1243_v0  ;;  %v970_v52 = vld [vmem:[%s1507_s5 + $0x10] sm:$0xff]  ;;  %vm583_vm10 = vcmask 261120  }
  0x2a   : > { %442 = vst.msk [vmem:[#allocation2 + $0x1] sm:$0xff] %vm437_vm0, %v435_v1  ;;  %v544_v37 = vpack.c.b16 %v542_v36, %v542_v36  ;;  %v1074_v46 = vld [vmem:[%s1506_s4] ss:$0 sm:$0xff]  ;;  %623 = vmatpush.bf16.msra.mxu2 %v970_v52  ;;  %v969_v53 = vld [vmem:[%s1507_s5 + $0x8] sm:$0xff]  ;;  %vm614_vm11 = vcmask 392192   ;;  %s1249_s16 = smov 96  }
  0x2b   : > { %443 = vst.msk [vmem:[#allocation2 + $0x9] sm:$0xff] %vm437_vm0, %v436_v2  ;;  %v968_v54 = vld [vmem:[%s1507_s5] sm:$0xff]  ;;  %s1250_s22 = smov 80   ;;  %s1251_s25 = smov 64   ;;  %v976_v11 = vld [vmem:[#allocation10 + $0x28] sm:$0xff]  ;;  %v975_v12 = vld [vmem:[#allocation10 + $0x20] sm:$0xff] }
  0x2c   : > { %567 = vst.msk [vmem:[#allocation4] sm:$0xff] %vm527_vm7, %v1243_v0  ;;  %v552_v38 = vsel %vm550_vm6, %v544_v37, 0  ;;  %v1075_v61 = vld [vmem:[%s1508_s6] ss:$0 sm:$0xff]  ;;  %s1252_s30 = smov 112   ;;  %v978_v9 = vld [vmem:[#allocation10 + $0x38] sm:$0xff] }
  0x2d   : > { %560 = vmatpush.bf16.msra.mxu1 %v552_v38  ;;  %569 = vst.msk [vmem:[#allocation4 + $0x8] sm:$0x3] %vm568_vm9, %v1243_v0  ;;  %738 = vmatpush.bf16.msra.mxu3 %v978_v9  ;;  %v977_v10 = vld [vmem:[#allocation10 + $0x30] sm:$0xff]  ;;  %vm664_vm12 = vcmask 523264   ;;  %vm666_vm13 = vcmask 654336   ;;  %vm668_vm14 = vcmask 785408  }
  0x2e   : > { %624 = vmatpush.bf16.msra.mxu2 %v969_v53  ;;  %vm670_vm15 = vcmask 916480   ;;  %s427_s19 = sand.u32 1, %s1228_s18   ;;  %s1186_s1 = scalar_lea.hbm %s1513_s11, 2 }
  0x31   : > { %v446_v3 = vld [vmem:[#allocation2 + $0x1] sm:$0xff]  ;;  %561 = vmatpush.bf16.msra.mxu1 %v967_v39  ;;  %739 = vmatpush.bf16.msra.mxu3 %v977_v10 }
  0x32   : > { %v447_v4 = vld [vmem:[#allocation2 + $0x9] sm:$0xff]  ;;  %v444_v16 = vld [vmem:[#allocation2] sm:$0xff]  ;;  %625 = vmatpush.bf16.msra.mxu2 %v968_v54 }
  0x33   : > { %v1063_v5 = vpack.i.bf16 %v447_v4, %v446_v3  ;;  %v448_v6 = vld [vmem:[#allocation2 + $0x2] sm:$0xff]  ;;  %v449_v7 = vld [vmem:[#allocation2 + $0xa] sm:$0xff] }
  0x34   : > { %v1068_v8 = vpack.i.bf16 %v449_v7, %v448_v6  ;;  %v445_v17 = vld [vmem:[#allocation2 + $0x8] sm:$0xff] }
  0x35   : > { %1064 = vrot.lane.b32.xlu0 %v1063_v5, %s1244_s29  ;;  %740 = vmatpush.bf16.msra.mxu3 %v976_v11  ;;  %s797_s29 = scalar_lea.hbm %s1513_s11, %s1334_s21 }
  0x39   : > { %741 = vmatpush.bf16.msra.mxu3 %v975_v12 }
  0x3d   : > { %1069 = vrot.lane.b32.xlu0 %v1068_v8, %s1245_s13 }
  0xa7   : > { %v1065_v13 = vpop.permute.xlu0 %1064 }
  0xa8   : > { %v1067_v14 = vunpack.i.h.bf16 %v1065_v13  ;;  %v1066_v15 = vunpack.i.l.bf16 %v1065_v13  ;;  %v974_v13 = vld [vmem:[#allocation10 + $0x18] sm:$0xff] }
  0xa9   : > { %742 = vmatpush.bf16.msra.mxu3 %v974_v13 }
  0xaa   : > { %v466_v21 = vsel %vm437_vm0, %v444_v16, %v1066_v15  ;;  %v467_v22 = vsel %vm437_vm0, %v445_v17, %v1067_v14  ;;  %v973_v14 = vld [vmem:[#allocation10 + $0x10] sm:$0xff]  ;;  %v972_v15 = vld [vmem:[#allocation10 + $0x8] sm:$0xff]  ;;  %v971_v16 = vld [vmem:[#allocation10] sm:$0xff]  ;;  %vm786_vm0 = vcmask 57344  }
  0xab   : > { %v980_v17 = vld [vmem:[%s1511_s9 + $0x8] sm:$0xff] }
  0xac   : > { %779 = vmatpush.bf16.msrb.mxu0 %v980_v17 }
  0xad   : > { %743 = vmatpush.bf16.msra.mxu3 %v973_v14 }
  0xaf   : > { %v1070_v18 = vpop.permute.xlu0 %1069 }
  0xb0   : > { %v1072_v19 = vunpack.i.h.bf16 %v1070_v18  ;;  %v1071_v20 = vunpack.i.l.bf16 %v1070_v18  ;;  %v979_v18 = vld [vmem:[%s1511_s9] sm:$0xff] }
  0xb1   : > { %744 = vmatpush.bf16.msra.mxu3 %v972_v15  ;;  %780 = vmatpush.bf16.msrb.mxu0 %v979_v18 }
  0xb2   : > { %v469_v23 = vsel %vm468_vm3, %v466_v21, %v1071_v20  ;;  %v470_v24 = vsel %vm468_vm3, %v467_v22, %v1072_v19 }
  0xb3   : > { %v471_v25 = vpack.c.bf16 %v470_v24, %v469_v23 }
  0xb5   : > { %903 = vmatmul.msk.bf16.vlgmr.msra.gmra.mxu0 %vm483_vm4, %v471_v25  ;;  %745 = vmatpush.bf16.msra.mxu3 %v971_v16 }
 0x132   : > { %v500_v27 = vpop.f32.mrf.mxu0 }
 0x133   : > { %v501_v28 = vadd.f32 %v1073_v26, %v500_v27 }
 0x135   : > { %v505_v29 = vmax.f32 %v501_v28, 0.0 }
 0x137   : > { %511 = vst.msk [vmem:[#allocation3 + $0x1] sm:$0xff] %vm468_vm3, %v505_v29 }
 0x13a   : > { %v502_v30 = vpop.f32.mrf.mxu0 }
 0x13b   : > { %v503_v31 = vadd.f32 %v1073_v26, %v502_v30 }
 0x13d   : > { %v506_v32 = vmax.f32 %v503_v31, 0.0 }
 0x13f   : > { %512 = vst.msk [vmem:[#allocation3 + $0x9] sm:$0xff] %vm468_vm3, %v506_v32 }
 0x146   : > { %v515_v33 = vld [vmem:[#allocation3 + $0x1] ss:$2 sm:$0xff]  ;;  %v517_v34 = vld [vmem:[#allocation3 + $0x2] ss:$2 sm:$0xff] }
 0x147   : > { %519 = vrot.lane.b32.xlu1 %v515_v33, %s1245_s13  ;;  %v513_v41 = vld [vmem:[#allocation3] ss:$2 sm:$0xff]  ;;  %s1248_s13 = smov 48  }
 0x14f   : > { %523 = vrot.lane.b32.xlu1 %v517_v34, %s1246_s24  ;;  %v689_v34 = vld [vmem:[%s1510_s8] sm:$0x1] }
 0x1b9   : > { %v520_v40 = vpop.permute.xlu1 %519 }
 0x1ba   : > { %v526_v42 = vsel %vm468_vm3, %v513_v41, %v520_v40  ;;  %v757_v40 = vld [vmem:[%s1512_s10] sm:$0x1] }
 0x1c1   : > { %v524_v43 = vpop.permute.xlu1 %523 }
 0x1c2   : > { %v528_v44 = vsel %vm527_vm7, %v526_v42, %v524_v43 }
 0x1c3   : > { %v529_v45 = vpack.c.bf16 %v528_v44, %v528_v44 }
 0x1c5   : > { %908 = vmatmul.msk.bf16.vlgmr.msra.gmra.mxu1 %vm546_vm8, %v529_v45 }
 0x242   : > { %v563_v47 = vpop.f32.mrf.mxu1 }
 0x243   : > { %v564_v48 = vadd.f32 %v1074_v46, %v563_v47 }
 0x245   : > { %570 = vst.msk [vmem:[#allocation4 + $0x1] sm:$0xff] %vm527_vm7, %v564_v48 }
 0x24a   : > { %v565_v49 = vpop.f32.mrf.mxu1 }
 0x24c   : > { %v572_v50 = vld [vmem:[#allocation4 + $0x1] sm:$0xff] }
 0x24d   : > { %575 = vrot.lane.b32.xlu2 %v572_v50, %s1246_s24  ;;  %v573_v51 = vld [vmem:[#allocation4 + $0x2] sm:$0xff] }
 0x24e   : > { %v571_v56 = vld [vmem:[#allocation4] sm:$0xff] }
 0x255   : > { %579 = vrot.lane.b32.xlu2 %v573_v51, %s1247_s12 }
 0x2a7   : > { %v576_v55 = vpop.permute.xlu2 %575 }
 0x2a8   : > { %v582_v57 = vsel %vm527_vm7, %v571_v56, %v576_v55 }
 0x2af   : > { %v580_v58 = vpop.permute.xlu2 %579 }
 0x2b0   : > { %v584_v59 = vsel %vm583_vm10, %v582_v57, %v580_v58 }
 0x2b1   : > { %v585_v60 = vpack.c.bf16 %v584_v59, %v584_v59 }
 0x2b3   : > { %921 = vmatmul.msk.bf16.vlgmr.msra.gmra.mxu2 %vm614_vm11, %v585_v60 }
 0x336   : > { %v627_v62 = vpop.f32.mrf.mxu2 }
 0x337   : > { %v628_v63 = vadd.f32 %v1075_v61, %v627_v62 }
 0x339   : > { %v631_v0 = vmax.f32 %v628_v63, 0.0 }
 0x33b   : > { %v641_v1 = vrot.slane %v631_v0, 3  ;;  %v637_v2 = vrot.slane %v631_v0, 2  ;;  %v633_v3 = vrot.slane %v631_v0, 1  ;;  %v653_v5 = vrot.slane %v631_v0, 6 }
 0x33c   : > { %v649_v6 = vrot.slane %v631_v0, 5  ;;  %v645_v7 = vrot.slane %v631_v0, 4  ;;  %v657_v8 = vrot.slane %v631_v0, 7 }
 0x33d   : > { %642 = vrot.lane.b32.xlu2 %v641_v1, %s1248_s13  ;;  %638 = vrot.lane.b32.xlu1 %v637_v2, %s1247_s12 }
 0x33e   : > { %634 = vrot.lane.b32.xlu0 %v633_v3, %s1246_s24  ;;  %v629_v4 = vpop.f32.mrf.mxu2  ;;  %s789_s24 = scalar_lea.sflag [#allocation7], %s427_s19 }
 0x345   : > { %654 = vrot.lane.b32.xlu2 %v653_v5, %s1249_s16  ;;  %650 = vrot.lane.b32.xlu1 %v649_v6, %s1250_s22  ;;  %s428_s22 = scalar_lea.vmem [#allocation11], %s427_s19 }
 0x346   : > { %646 = vrot.lane.b32.xlu0 %v645_v7, %s1251_s25  ;;  %s799_s25 = sshll.u32 %s428_s22, 4  ;;  %s800_s25 = int_to_ptr.vmem [resolvable:$true] %s799_s25 }
 0x34e   : > { %658 = vrot.lane.b32.xlu0 %v657_v8, %s1252_s30  ;;  %s801_s30 = sshll.u32 %s797_s29, 4  ;;  %s802_s30 = int_to_ptr.hbm [resolvable:$true] %s801_s30 }
 0x34f   : > { %s1180_s12 = sshra.s32 %s802_s30, 4  ;;  %s1181_s12 = int_to_ptr.hbm [resolvable:$true] %s1180_s12 }
 0x350   : > { %s1182_s14 = scalar_lea.hbm %s1181_s12, 1  ;;  %p1187_p3 = scmp.lt.s32.totalorder %s1181_s12, %s1513_s11 }
 0x351   : > { %p1183_p0 = scmp.ne.s32.totalorder %s1181_s12, %s1182_s14  ;;  %p1188_p4 = scmp.lt.s32.totalorder %s1186_s1, %s1182_s14 }
 0x353   : > { %p1184_p1 = pnand %p1183_p0, %p1351_p5  ;;  %p1189_p7 = por %p1188_p4, %p1187_p3 }
 0x355   : > { %p1185_p2 = pneg %p1184_p1 }
 0x357   : > { %p1190_p8 = pnand %p1189_p7, %p1185_p2 }
 0x397   : > { %v643_v22 = vpop.permute.xlu2 %642 }
 0x39f   : > { %v655_v29 = vpop.permute.xlu2 %654 }
 0x3af   : > { %v639_v19 = vpop.permute.xlu1 %638 }
 0x3b0   : > { %v635_v20 = vpop.permute.xlu0 %634 }
 0x3b1   : > { %v661_v21 = vsel %vm527_vm7, %v631_v0, %v635_v20 }
 0x3b2   : > { %v662_v23 = vsel %vm583_vm10, %v661_v21, %v639_v19 }
 0x3b3   : > { %v663_v25 = vsel %vm614_vm11, %v662_v23, %v643_v22 }
 0x3b7   : > { %v651_v26 = vpop.permute.xlu1 %650 }
 0x3b8   : > { %v647_v24 = vpop.permute.xlu0 %646 }
 0x3b9   : > { %v665_v27 = vsel %vm664_vm12, %v663_v25, %v647_v24 }
 0x3ba   : > { %v667_v28 = vsel %vm666_vm13, %v665_v27, %v651_v26 }
 0x3bb   : > { %v669_v31 = vsel %vm668_vm14, %v667_v28, %v655_v29 }
 0x3c0   : > { %v659_v30 = vpop.permute.xlu0 %658 }
 0x3c1   : > { %v671_v32 = vsel %vm670_vm15, %v669_v31, %v659_v30 }
 0x3c2   : > { %v672_v33 = vpack.c.bf16 %v671_v32, %v671_v32 }
 0x3c4   : > { %746 = vmatmul.bf16.vlgmr.msra.gmra.mxu3 %v672_v33 }
 0x447   : > { %v747_v35 = vpop.f32.mrf.mxu3 }
 0x448   : > { %v748_v36 = vadd.f32 %v747_v35, %v689_v34 }
 0x44a   : > { %v751_v37 = vmax.f32 %v748_v36, 0.0 }
 0x44c   : > { %v752_v38 = vpack.c.bf16 %v751_v37, %v751_v37 }
 0x44e   : > { %962 = vmatmul.msk.bf16.vlgmr.msrb.gmra.mxu0 %vm583_vm10, %v752_v38 }
 0x44f   : > { %v749_v39 = vpop.f32.mrf.mxu3 }
 0x4cb   : > { %v782_v41 = vpop.f32.mrf.mxu0 }
 0x4cc   : > { %v783_v42 = vadd.f32 %v782_v41, %v757_v40 }
 0x4ce   : > { %787 = vst.msk [vmem:[%s428_s22] sm:$0x1] %vm786_vm0, %v783_v42 }
 0x4cf   : > { %1193 = shalt.err (!%p1190_p8)
}
 0x4d0   : > { %993 = dma.vmem_to_hbm [thread:$0]  (%p1351_p5), %s800_s25, 16, %s802_s30, %s789_s24  }
 0x4d3   : > { %v784_v43 = vpop.f32.mrf.mxu0 }
 0x4d4 PF: > { %p1015_p9 = scmp.ge.s32.totalorder %s1236_s20, 2  ;;  %s813_s19 = sand.u32 1, %s1224_s17  }
 0x4d5   : > { %s814_s26 = scalar_lea.sflag [#allocation7], %s813_s19 }
 0x4d6   : > { %p1006_p10 = pnand %p1015_p9, %p1355_p6 }
 0x4d8   : > { %p1007_p11 = pneg %p1006_p10 }
 0x4da   : > { %1219 = dma.done.wait (%p1007_p11), %s814_s26, 16  }
 0x4db   : > { %1221 = vsyncadd (%p1007_p11), %s814_s26, 4294967280  ;;  %s1528_s20 = sld [smem:[#allocation16_spill]]  ;;  %s1531_s17 = smov %s1228_s18 }
 0x4dc   : > { %s1529_s29 = sld [smem:[#allocation15_spill]] }
 0x4dd   : > { %s1530_s19 = sld [smem:[#allocation17_spill]] }
 0x4e1   : > { %p23_p12 = scmp.ge.s32.totalorder %s1528_s20, 4  }
 0x4e2   : > { %s1532_s18 = smov %s1529_s29 }
 0x4e3   :  { %25 = sbr.rel (!%p23_p12) target bundleno = 8 (0x8), region = 114 }
 0x4e8   :  { %819 = vsyncpa [#allocation6], 1 }
 0x4e9   :  { %821 = vsyncpa [#allocation6 + $0x1], 1 }
 0x4ea   :  { %822 = vsyncpa [#allocation9], 1 }
 0x4eb   :  { %823 = vsyncpa [#allocation7], 1 }
 0x4ec   :  { %825 = vsyncpa [#allocation7 + $0x1], 1 }

</bundles_post_ra>
